<compile_context>
chip_gen: v5e
topology: v5e:2x2
jax: 0.10.0
libtpu: 0.0.40
codegen_flags: <defaults>
</compile_context>

<pallas_src>
import functools
import math

import jax
import jax.numpy as jnp
from jax.experimental import pallas as pl
from jax.experimental.pallas import tpu as pltpu


def _self_attn_kernel(xq_ref, xkv_ref,
                      wq_ref, wk_ref, wv_ref, wo_ref,
                      bq_ref, bk_ref, bv_ref, bo_ref,
                      out_ref,
                      q_sc, m_sc, l_sc, acc_sc, mean_sc,
                      *, scale, seq_len):
    qi = pl.program_id(1)
    ki = pl.program_id(2)
    nq = pl.num_programs(1)
    nk = pl.num_programs(2)

    # ---- first KV step of a q-tile: fused Q projection + stats init ----
    @pl.when(ki == 0)
    def _():
        xq = xq_ref[0]                                          # (tq, E)
        q = jnp.dot(xq, wq_ref[...],
                    preferred_element_type=jnp.float32) + bq_ref[...]
        q_sc[...] = q * scale                  # fold 1/sqrt(E) into Q once
        m_sc[...] = jnp.full_like(m_sc, -jnp.inf)
        l_sc[...] = jnp.zeros_like(l_sc)
        acc_sc[...] = jnp.zeros_like(acc_sc)

    # ---- first step of a batch element: reset the sequence-mean accumulator ----
    @pl.when(jnp.logical_and(qi == 0, ki == 0))
    def _():
        mean_sc[...] = jnp.zeros_like(mean_sc)

    # ---- every step: fused K/V projections + online-softmax update ----
    xkv = xkv_ref[0]                                            # (tk, E)
    k = jnp.dot(xkv, wk_ref[...],
                preferred_element_type=jnp.float32) + bk_ref[...]
    v = jnp.dot(xkv, wv_ref[...],
                preferred_element_type=jnp.float32) + bv_ref[...]

    q = q_sc[...]                                               # (tq, E), pre-scaled f32
    # Q K^T without materializing a transpose: contract the E dims directly.
    s = jax.lax.dot_general(q, k, (((1,), (1,)), ((), ())),
                            preferred_element_type=jnp.float32)  # (tq, tk)

    m_prev = m_sc[...]
    m_new = jnp.maximum(m_prev, s.max(axis=-1, keepdims=True))
    alpha = jnp.exp(m_prev - m_new)
    p = jnp.exp(s - m_new)
    l_sc[...] = alpha * l_sc[...] + p.sum(axis=-1, keepdims=True)
    acc_sc[...] = alpha * acc_sc[...] + jnp.dot(
        p, v, preferred_element_type=jnp.float32)
    m_sc[...] = m_new

    # ---- last KV step of a q-tile: normalize, out-projection, mean accumulate ----
    @pl.when(ki == nk - 1)
    def _():
        o = acc_sc[...] * pl.reciprocal(l_sc[...], approx=True)  # (tq, E)
        proj = jnp.dot(o, wo_ref[...],
                       preferred_element_type=jnp.float32) + bo_ref[...]
        mean_sc[...] += jnp.sum(proj, axis=0, keepdims=True)

    # ---- very last step for this batch element: write the (1, E) mean ----
    @pl.when(jnp.logical_and(qi == nq - 1, ki == nk - 1))
    def _():
        mean = mean_sc[...] * (1.0 / seq_len)                    # (1, E)
        out_ref[...] = mean[None].astype(out_ref.dtype)          # (1, 1, E)


def _pick_tile(n, pref=256):
    if n <= pref:
        return n
    for t in (pref, 128, 64, 32, 16, 8):
        if n % t == 0:
            return t
    return n


def self_attention_pallas(x, wq, wk, wv, wo, bq, bk, bv, bo,
                          *, block_q=None, block_k=None):
    """Fused single-head self-attention followed by mean over the sequence.

    x: (B, S, E); wq/wk/wv/wo: (E, E) matmul-ready (q = x @ wq + bq);
    bq/bk/bv/bo: (E,). Returns (B, E) == MultiheadAttention(x, x, x).mean(dim=1).
    """
    B, S, E = x.shape
    tq = block_q or _pick_tile(S)
    tk = block_k or _pick_tile(S)
    assert S % tq == 0 and S % tk == 0, "sequence length must tile evenly"

    scale = 1.0 / math.sqrt(E)
    b2 = lambda b: b.reshape(1, E)
    kernel = functools.partial(_self_attn_kernel, scale=scale, seq_len=S)

    x_q_spec = pl.BlockSpec((1, tq, E), lambda b, qi, ki: (b, qi, 0))
    x_kv_spec = pl.BlockSpec((1, tk, E), lambda b, qi, ki: (b, ki, 0))
    w_spec = pl.BlockSpec((E, E), lambda b, qi, ki: (0, 0))       # VMEM-resident
    bias_spec = pl.BlockSpec((1, E), lambda b, qi, ki: (0, 0))

    out = pl.pallas_call(
        kernel,
        out_shape=jax.ShapeDtypeStruct((B, 1, E), x.dtype),
        grid_spec=pltpu.PrefetchScalarGridSpec(
            num_scalar_prefetch=0,
            grid=(B, S // tq, S // tk),
            in_specs=[x_q_spec, x_kv_spec,
                      w_spec, w_spec, w_spec, w_spec,
                      bias_spec, bias_spec, bias_spec, bias_spec],
            out_specs=pl.BlockSpec((1, 1, E), lambda b, qi, ki: (b, 0, 0)),
            scratch_shapes=[
                pltpu.VMEM((tq, E), jnp.float32),   # pre-scaled Q tile
                pltpu.VMEM((tq, 1), jnp.float32),   # running max m_i
                pltpu.VMEM((tq, 1), jnp.float32),   # running sum l_i
                pltpu.VMEM((tq, E), jnp.float32),   # running (p @ v) accumulator
                pltpu.VMEM((1, E), jnp.float32),    # sequence-mean accumulator
            ]),
        compiler_params=pltpu.CompilerParams(
            dimension_semantics=("parallel", "arbitrary", "arbitrary")),
    )(x, x, wq, wk, wv, wo, b2(bq), b2(bk), b2(bv), b2(bo))

    return out.reshape(B, E)


def self_attention_ref(x, wq, wk, wv, wo, bq, bk, bv, bo):
    """Pure-JAX reference matching PyTorch nn.MultiheadAttention (1 head)."""
    _, _, E = x.shape
    q = x @ wq + bq
    k = x @ wk + bk
    v = x @ wv + bv
    s = jnp.einsum("bqd,bkd->bqk", q, k) / math.sqrt(E)
    a = jax.nn.softmax(s, axis=-1)
    o = jnp.einsum("bqk,bkd->bqd", a, v)
    out = o @ wo + bo
    return out.mean(axis=1)


if __name__ == "__main__":
    key = jax.random.PRNGKey(0)
    B, S, E = 2, 8, 32                      # small shapes for the smoke test
    ks = jax.random.split(key, 9)
    dt = jnp.float32
    w_scale = 1.0 / math.sqrt(E)

    x = jax.random.normal(ks[0], (B, S, E), dt)
    wq = jax.random.normal(ks[1], (E, E), dt) * w_scale
    wk = jax.random.normal(ks[2], (E, E), dt) * w_scale
    wv = jax.random.normal(ks[3], (E, E), dt) * w_scale
    wo = jax.random.normal(ks[4], (E, E), dt) * w_scale
    bq = jax.random.normal(ks[5], (E,), dt) * 0.1
    bk = jax.random.normal(ks[6], (E,), dt) * 0.1
    bv = jax.random.normal(ks[7], (E,), dt) * 0.1
    bo = jax.random.normal(ks[8], (E,), dt) * 0.1

    out = jax.block_until_ready(
        self_attention_pallas(x, wq, wk, wv, wo, bq, bk, bv, bo))
    ref = jax.block_until_ready(
        self_attention_ref(x, wq, wk, wv, wo, bq, bk, bv, bo))

    if out.shape != (B, E) or not bool(jnp.allclose(out, ref, atol=2e-2, rtol=2e-2)):
        raise AssertionError(
            "Pallas output mismatch: max abs err = "
            f"{float(jnp.max(jnp.abs(out - ref)))}")
    print("KERNEL_OK")
</pallas_src>

<mosaic_0001>
module attributes {stable_mosaic.version = 11 : i64} {
  func.func @_self_attn_kernel(%arg0: i32, %arg1: i32, %arg2: i32, %arg3: memref<1x8x32xf32, #tpu.memory_space<vmem>>, %arg4: memref<1x8x32xf32, #tpu.memory_space<vmem>>, %arg5: memref<32x32xf32, #tpu.memory_space<vmem>>, %arg6: memref<32x32xf32, #tpu.memory_space<vmem>>, %arg7: memref<32x32xf32, #tpu.memory_space<vmem>>, %arg8: memref<32x32xf32, #tpu.memory_space<vmem>>, %arg9: memref<1x32xf32, #tpu.memory_space<vmem>>, %arg10: memref<1x32xf32, #tpu.memory_space<vmem>>, %arg11: memref<1x32xf32, #tpu.memory_space<vmem>>, %arg12: memref<1x32xf32, #tpu.memory_space<vmem>>, %arg13: memref<1x1x32xf32, #tpu.memory_space<vmem>>, %arg14: memref<8x32xf32, #tpu.memory_space<vmem>>, %arg15: memref<8x1xf32, #tpu.memory_space<vmem>>, %arg16: memref<8x1xf32, #tpu.memory_space<vmem>>, %arg17: memref<8x32xf32, #tpu.memory_space<vmem>>, %arg18: memref<1x32xf32, #tpu.memory_space<vmem>>) attributes {dimension_semantics = [#tpu.dimension_semantics<parallel>, #tpu.dimension_semantics<arbitrary>, #tpu.dimension_semantics<arbitrary>], iteration_bounds = array<i64: 2, 1, 1>, scalar_prefetch = 0 : i64, scratch_operands = 5 : i64, tpu.core_type = #tpu.core_type<tc>, window_params = [{transform_indices = @transform_0, window_bounds = array<i64: 1, 8, 32>}, {transform_indices = @transform_1, window_bounds = array<i64: 1, 8, 32>}, {pipeline_mode = #tpu.pipeline_mode<synchronous>, transform_indices = @transform_2, window_bounds = array<i64: 32, 32>}, {pipeline_mode = #tpu.pipeline_mode<synchronous>, transform_indices = @transform_3, window_bounds = array<i64: 32, 32>}, {pipeline_mode = #tpu.pipeline_mode<synchronous>, transform_indices = @transform_4, window_bounds = array<i64: 32, 32>}, {pipeline_mode = #tpu.pipeline_mode<synchronous>, transform_indices = @transform_5, window_bounds = array<i64: 32, 32>}, {pipeline_mode = #tpu.pipeline_mode<synchronous>, transform_indices = @transform_6, window_bounds = array<i64: 1, 32>}, {pipeline_mode = #tpu.pipeline_mode<synchronous>, transform_indices = @transform_7, window_bounds = array<i64: 1, 32>}, {pipeline_mode = #tpu.pipeline_mode<synchronous>, transform_indices = @transform_8, window_bounds = array<i64: 1, 32>}, {pipeline_mode = #tpu.pipeline_mode<synchronous>, transform_indices = @transform_9, window_bounds = array<i64: 1, 32>}, {transform_indices = @transform_10, window_bounds = array<i64: 1, 1, 32>}]} {
    %c0_i32 = arith.constant 0 : i32
    %0 = arith.cmpi eq, %arg2, %c0_i32 : i32
    %1 = arith.extui %0 : i1 to i32
    %c0_i32_0 = arith.constant 0 : i32
    %2 = arith.cmpi ne, %1, %c0_i32_0 : i32
    scf.if %2 {
      %c0_38 = arith.constant 0 : index
      %c0_39 = arith.constant 0 : index
      %c0_40 = arith.constant 0 : index
      %52 = vector.load %arg3[%c0_38, %c0_39, %c0_40] : memref<1x8x32xf32, #tpu.memory_space<vmem>>, vector<1x8x32xf32>
      %53 = vector.shape_cast %52 : vector<1x8x32xf32> to vector<8x32xf32>
      %c0_41 = arith.constant 0 : index
      %c0_42 = arith.constant 0 : index
      %54 = vector.load %arg5[%c0_41, %c0_42] : memref<32x32xf32, #tpu.memory_space<vmem>>, vector<32x32xf32>
      %cst_43 = arith.constant dense<0.000000e+00> : vector<8x32xf32>
      %55 = tpu.matmul %53, %54, %cst_43 {dimension_numbers = #tpu.dot_dimension_numbers<[1], [0], [0], [1], [0, 0, 1, 1], [], []>} : vector<8x32xf32>, vector<32x32xf32>, vector<8x32xf32> -> vector<8x32xf32>
      %c0_44 = arith.constant 0 : index
      %c0_45 = arith.constant 0 : index
      %56 = vector.load %arg9[%c0_44, %c0_45] : memref<1x32xf32, #tpu.memory_space<vmem>>, vector<1x32xf32>
      %57 = vector.broadcast %56 : vector<1x32xf32> to vector<8x32xf32>
      %58 = arith.addf %55, %57 : vector<8x32xf32>
      %cst_46 = arith.constant 0.176776692 : f32
      %59 = vector.broadcast %cst_46 : f32 to vector<8x32xf32>
      %60 = arith.mulf %58, %59 : vector<8x32xf32>
      %c0_47 = arith.constant 0 : index
      %c0_48 = arith.constant 0 : index
      %61 = vector.load %arg14[%c0_47, %c0_48] : memref<8x32xf32, #tpu.memory_space<vmem>>, vector<8x32xf32>
      tpu.vector_store %arg14[%c0_47, %c0_48], %60 {strides = array<i32>} : memref<8x32xf32, #tpu.memory_space<vmem>>, vector<8x32xf32>,
      %cst_49 = arith.constant 0xFF800000 : f32
      %62 = vector.broadcast %cst_49 : f32 to vector<8x1xf32>
      %c0_50 = arith.constant 0 : index
      %c0_51 = arith.constant 0 : index
      %63 = vector.load %arg15[%c0_50, %c0_51] : memref<8x1xf32, #tpu.memory_space<vmem>>, vector<8x1xf32>
      tpu.vector_store %arg15[%c0_50, %c0_51], %62 {strides = array<i32>} : memref<8x1xf32, #tpu.memory_space<vmem>>, vector<8x1xf32>,
      %cst_52 = arith.constant 0.000000e+00 : f32
      %64 = vector.broadcast %cst_52 : f32 to vector<8x1xf32>
      %c0_53 = arith.constant 0 : index
      %c0_54 = arith.constant 0 : index
      %65 = vector.load %arg16[%c0_53, %c0_54] : memref<8x1xf32, #tpu.memory_space<vmem>>, vector<8x1xf32>
      tpu.vector_store %arg16[%c0_53, %c0_54], %64 {strides = array<i32>} : memref<8x1xf32, #tpu.memory_space<vmem>>, vector<8x1xf32>,
      %cst_55 = arith.constant 0.000000e+00 : f32
      %66 = vector.broadcast %cst_55 : f32 to vector<8x32xf32>
      %c0_56 = arith.constant 0 : index
      %c0_57 = arith.constant 0 : index
      %67 = vector.load %arg17[%c0_56, %c0_57] : memref<8x32xf32, #tpu.memory_space<vmem>>, vector<8x32xf32>
      tpu.vector_store %arg17[%c0_56, %c0_57], %66 {strides = array<i32>} : memref<8x32xf32, #tpu.memory_space<vmem>>, vector<8x32xf32>,
    } else {
    }
    %c0_i32_1 = arith.constant 0 : i32
    %3 = arith.cmpi eq, %arg1, %c0_i32_1 : i32
    %c0_i32_2 = arith.constant 0 : i32
    %4 = arith.cmpi eq, %arg2, %c0_i32_2 : i32
    %5 = arith.andi %3, %4 : i1
    %6 = arith.extui %5 : i1 to i32
    %c0_i32_3 = arith.constant 0 : i32
    %7 = arith.cmpi ne, %6, %c0_i32_3 : i32
    scf.if %7 {
      %cst_38 = arith.constant 0.000000e+00 : f32
      %52 = vector.broadcast %cst_38 : f32 to vector<1x32xf32>
      %c0_39 = arith.constant 0 : index
      %c0_40 = arith.constant 0 : index
      %53 = vector.load %arg18[%c0_39, %c0_40] : memref<1x32xf32, #tpu.memory_space<vmem>>, vector<1x32xf32>
      tpu.vector_store %arg18[%c0_39, %c0_40], %52 {strides = array<i32>} : memref<1x32xf32, #tpu.memory_space<vmem>>, vector<1x32xf32>,
    } else {
    }
    %c0 = arith.constant 0 : index
    %c0_4 = arith.constant 0 : index
    %c0_5 = arith.constant 0 : index
    %8 = vector.load %arg4[%c0, %c0_4, %c0_5] : memref<1x8x32xf32, #tpu.memory_space<vmem>>, vector<1x8x32xf32>
    %9 = vector.shape_cast %8 : vector<1x8x32xf32> to vector<8x32xf32>
    %c0_6 = arith.constant 0 : index
    %c0_7 = arith.constant 0 : index
    %10 = vector.load %arg6[%c0_6, %c0_7] : memref<32x32xf32, #tpu.memory_space<vmem>>, vector<32x32xf32>
    %cst = arith.constant dense<0.000000e+00> : vector<8x32xf32>
    %11 = tpu.matmul %9, %10, %cst {dimension_numbers = #tpu.dot_dimension_numbers<[1], [0], [0], [1], [0, 0, 1, 1], [], []>} : vector<8x32xf32>, vector<32x32xf32>, vector<8x32xf32> -> vector<8x32xf32>
    %c0_8 = arith.constant 0 : index
    %c0_9 = arith.constant 0 : index
    %12 = vector.load %arg10[%c0_8, %c0_9] : memref<1x32xf32, #tpu.memory_space<vmem>>, vector<1x32xf32>
    %13 = vector.broadcast %12 : vector<1x32xf32> to vector<8x32xf32>
    %14 = arith.addf %11, %13 : vector<8x32xf32>
    %c0_10 = arith.constant 0 : index
    %c0_11 = arith.constant 0 : index
    %15 = vector.load %arg7[%c0_10, %c0_11] : memref<32x32xf32, #tpu.memory_space<vmem>>, vector<32x32xf32>
    %cst_12 = arith.constant dense<0.000000e+00> : vector<8x32xf32>
    %16 = tpu.matmul %9, %15, %cst_12 {dimension_numbers = #tpu.dot_dimension_numbers<[1], [0], [0], [1], [0, 0, 1, 1], [], []>} : vector<8x32xf32>, vector<32x32xf32>, vector<8x32xf32> -> vector<8x32xf32>
    %c0_13 = arith.constant 0 : index
    %c0_14 = arith.constant 0 : index
    %17 = vector.load %arg11[%c0_13, %c0_14] : memref<1x32xf32, #tpu.memory_space<vmem>>, vector<1x32xf32>
    %18 = vector.broadcast %17 : vector<1x32xf32> to vector<8x32xf32>
    %19 = arith.addf %16, %18 : vector<8x32xf32>
    %c0_15 = arith.constant 0 : index
    %c0_16 = arith.constant 0 : index
    %20 = vector.load %arg14[%c0_15, %c0_16] : memref<8x32xf32, #tpu.memory_space<vmem>>, vector<8x32xf32>
    %cst_17 = arith.constant dense<0.000000e+00> : vector<8x8xf32>
    %21 = tpu.matmul %20, %14, %cst_17 {dimension_numbers = #tpu.dot_dimension_numbers<[1], [1], [0], [0], [0, 0, 1, 0], [], []>} : vector<8x32xf32>, vector<8x32xf32>, vector<8x8xf32> -> vector<8x8xf32>
    %c0_18 = arith.constant 0 : index
    %c0_19 = arith.constant 0 : index
    %22 = vector.load %arg15[%c0_18, %c0_19] : memref<8x1xf32, #tpu.memory_space<vmem>>, vector<8x1xf32>
    %cst_20 = arith.constant dense<0xFF800000> : vector<8xf32>
    %23 = vector.multi_reduction <maximumf>, %21, %cst_20 [1] : vector<8x8xf32> to vector<8xf32>
    %24 = vector.shape_cast %23 : vector<8xf32> to vector<8x1xf32>
    %25 = arith.maximumf %22, %24 : vector<8x1xf32>
    %26 = arith.subf %22, %25 : vector<8x1xf32>
    %27 = math.exp %26 : vector<8x1xf32>
    %28 = vector.broadcast %25 : vector<8x1xf32> to vector<8x8xf32>
    %29 = arith.subf %21, %28 : vector<8x8xf32>
    %30 = math.exp %29 : vector<8x8xf32>
    %c0_21 = arith.constant 0 : index
    %c0_22 = arith.constant 0 : index
    %31 = vector.load %arg16[%c0_21, %c0_22] : memref<8x1xf32, #tpu.memory_space<vmem>>, vector<8x1xf32>
    %32 = arith.mulf %27, %31 : vector<8x1xf32>
    %cst_23 = arith.constant dense<0.000000e+00> : vector<8xf32>
    %33 = vector.multi_reduction <add>, %30, %cst_23 [1] : vector<8x8xf32> to vector<8xf32>
    %34 = vector.shape_cast %33 : vector<8xf32> to vector<8x1xf32>
    %35 = arith.addf %32, %34 : vector<8x1xf32>
    %c0_24 = arith.constant 0 : index
    %c0_25 = arith.constant 0 : index
    %36 = vector.load %arg16[%c0_24, %c0_25] : memref<8x1xf32, #tpu.memory_space<vmem>>, vector<8x1xf32>
    tpu.vector_store %arg16[%c0_24, %c0_25], %35 {strides = array<i32>} : memref<8x1xf32, #tpu.memory_space<vmem>>, vector<8x1xf32>,
    %c0_26 = arith.constant 0 : index
    %c0_27 = arith.constant 0 : index
    %37 = vector.load %arg17[%c0_26, %c0_27] : memref<8x32xf32, #tpu.memory_space<vmem>>, vector<8x32xf32>
    %38 = vector.broadcast %27 : vector<8x1xf32> to vector<8x32xf32>
    %39 = arith.mulf %38, %37 : vector<8x32xf32>
    %cst_28 = arith.constant dense<0.000000e+00> : vector<8x32xf32>
    %40 = tpu.matmul %30, %19, %cst_28 {dimension_numbers = #tpu.dot_dimension_numbers<[1], [0], [0], [1], [0, 0, 1, 1], [], []>} : vector<8x8xf32>, vector<8x32xf32>, vector<8x32xf32> -> vector<8x32xf32>
    %41 = arith.addf %39, %40 : vector<8x32xf32>
    %c0_29 = arith.constant 0 : index
    %c0_30 = arith.constant 0 : index
    %42 = vector.load %arg17[%c0_29, %c0_30] : memref<8x32xf32, #tpu.memory_space<vmem>>, vector<8x32xf32>
    tpu.vector_store %arg17[%c0_29, %c0_30], %41 {strides = array<i32>} : memref<8x32xf32, #tpu.memory_space<vmem>>, vector<8x32xf32>,
    %c0_31 = arith.constant 0 : index
    %c0_32 = arith.constant 0 : index
    %43 = vector.load %arg15[%c0_31, %c0_32] : memref<8x1xf32, #tpu.memory_space<vmem>>, vector<8x1xf32>
    tpu.vector_store %arg15[%c0_31, %c0_32], %25 {strides = array<i32>} : memref<8x1xf32, #tpu.memory_space<vmem>>, vector<8x1xf32>,
    %c0_i32_33 = arith.constant 0 : i32
    %44 = arith.cmpi eq, %arg2, %c0_i32_33 : i32
    %45 = arith.extui %44 : i1 to i32
    %c0_i32_34 = arith.constant 0 : i32
    %46 = arith.cmpi ne, %45, %c0_i32_34 : i32
    scf.if %46 {
      %c0_38 = arith.constant 0 : index
      %c0_39 = arith.constant 0 : index
      %52 = vector.load %arg17[%c0_38, %c0_39] : memref<8x32xf32, #tpu.memory_space<vmem>>, vector<8x32xf32>
      %c0_40 = arith.constant 0 : index
      %c0_41 = arith.constant 0 : index
      %53 = vector.load %arg16[%c0_40, %c0_41] : memref<8x1xf32, #tpu.memory_space<vmem>>, vector<8x1xf32>
      %54 = tpu.reciprocal %53 {approx = true} : vector<8x1xf32> -> vector<8x1xf32>
      %55 = vector.broadcast %54 : vector<8x1xf32> to vector<8x32xf32>
      %56 = arith.mulf %52, %55 : vector<8x32xf32>
      %c0_42 = arith.constant 0 : index
      %c0_43 = arith.constant 0 : index
      %57 = vector.load %arg8[%c0_42, %c0_43] : memref<32x32xf32, #tpu.memory_space<vmem>>, vector<32x32xf32>
      %cst_44 = arith.constant dense<0.000000e+00> : vector<8x32xf32>
      %58 = tpu.matmul %56, %57, %cst_44 {dimension_numbers = #tpu.dot_dimension_numbers<[1], [0], [0], [1], [0, 0, 1, 1], [], []>} : vector<8x32xf32>, vector<32x32xf32>, vector<8x32xf32> -> vector<8x32xf32>
      %c0_45 = arith.constant 0 : index
      %c0_46 = arith.constant 0 : index
      %59 = vector.load %arg12[%c0_45, %c0_46] : memref<1x32xf32, #tpu.memory_space<vmem>>, vector<1x32xf32>
      %60 = vector.broadcast %59 : vector<1x32xf32> to vector<8x32xf32>
      %61 = arith.addf %58, %60 : vector<8x32xf32>
      %c0_47 = arith.constant 0 : index
      %c0_48 = arith.constant 0 : index
      %62 = vector.load %arg18[%c0_47, %c0_48] : memref<1x32xf32, #tpu.memory_space<vmem>>, vector<1x32xf32>
      %cst_49 = arith.constant dense<0.000000e+00> : vector<32xf32>
      %63 = vector.multi_reduction <add>, %61, %cst_49 [0] : vector<8x32xf32> to vector<32xf32>
      %64 = vector.shape_cast %63 : vector<32xf32> to vector<1x32xf32>
      %65 = arith.addf %62, %64 : vector<1x32xf32>
      %c0_50 = arith.constant 0 : index
      %c0_51 = arith.constant 0 : index
      %66 = vector.load %arg18[%c0_50, %c0_51] : memref<1x32xf32, #tpu.memory_space<vmem>>, vector<1x32xf32>
      tpu.vector_store %arg18[%c0_50, %c0_51], %65 {strides = array<i32>} : memref<1x32xf32, #tpu.memory_space<vmem>>, vector<1x32xf32>,
    } else {
    }
    %c0_i32_35 = arith.constant 0 : i32
    %47 = arith.cmpi eq, %arg1, %c0_i32_35 : i32
    %c0_i32_36 = arith.constant 0 : i32
    %48 = arith.cmpi eq, %arg2, %c0_i32_36 : i32
    %49 = arith.andi %47, %48 : i1
    %50 = arith.extui %49 : i1 to i32
    %c0_i32_37 = arith.constant 0 : i32
    %51 = arith.cmpi ne, %50, %c0_i32_37 : i32
    scf.if %51 {
      %c0_38 = arith.constant 0 : index
      %c0_39 = arith.constant 0 : index
      %52 = vector.load %arg18[%c0_38, %c0_39] : memref<1x32xf32, #tpu.memory_space<vmem>>, vector<1x32xf32>
      %cst_40 = arith.constant 1.250000e-01 : f32
      %53 = vector.broadcast %cst_40 : f32 to vector<1x32xf32>
      %54 = arith.mulf %52, %53 : vector<1x32xf32>
      %55 = vector.shape_cast %54 : vector<1x32xf32> to vector<1x1x32xf32>
      %c0_41 = arith.constant 0 : index
      %c0_42 = arith.constant 0 : index
      %c0_43 = arith.constant 0 : index
      %56 = vector.load %arg13[%c0_41, %c0_42, %c0_43] : memref<1x1x32xf32, #tpu.memory_space<vmem>>, vector<1x1x32xf32>
      tpu.vector_store %arg13[%c0_41, %c0_42, %c0_43], %55 {strides = array<i32>} : memref<1x1x32xf32, #tpu.memory_space<vmem>>, vector<1x1x32xf32>,
    } else {
    }
    return
  }
  func.func @transform_0(%arg0: i32, %arg1: i32, %arg2: i32) -> (i32, i32, i32) {
    %c0_i32 = arith.constant 0 : i32
    %c0_i32_0 = arith.constant 0 : i32
    return %arg0, %arg1, %c0_i32 : i32, i32, i32
  }
  func.func @transform_1(%arg0: i32, %arg1: i32, %arg2: i32) -> (i32, i32, i32) {
    %c0_i32 = arith.constant 0 : i32
    %c0_i32_0 = arith.constant 0 : i32
    return %arg0, %arg2, %c0_i32 : i32, i32, i32
  }
  func.func @transform_2(%arg0: i32, %arg1: i32, %arg2: i32) -> (i32, i32) {
    %c0_i32 = arith.constant 0 : i32
    %c0_i32_0 = arith.constant 0 : i32
    %c0_i32_1 = arith.constant 0 : i32
    return %c0_i32, %c0_i32_0 : i32, i32
  }
  func.func @transform_3(%arg0: i32, %arg1: i32, %arg2: i32) -> (i32, i32) {
    %c0_i32 = arith.constant 0 : i32
    %c0_i32_0 = arith.constant 0 : i32
    %c0_i32_1 = arith.constant 0 : i32
    return %c0_i32, %c0_i32_0 : i32, i32
  }
  func.func @transform_4(%arg0: i32, %arg1: i32, %arg2: i32) -> (i32, i32) {
    %c0_i32 = arith.constant 0 : i32
    %c0_i32_0 = arith.constant 0 : i32
    %c0_i32_1 = arith.constant 0 : i32
    return %c0_i32, %c0_i32_0 : i32, i32
  }
  func.func @transform_5(%arg0: i32, %arg1: i32, %arg2: i32) -> (i32, i32) {
    %c0_i32 = arith.constant 0 : i32
    %c0_i32_0 = arith.constant 0 : i32
    %c0_i32_1 = arith.constant 0 : i32
    return %c0_i32, %c0_i32_0 : i32, i32
  }
  func.func @transform_6(%arg0: i32, %arg1: i32, %arg2: i32) -> (i32, i32) {
    %c0_i32 = arith.constant 0 : i32
    %c0_i32_0 = arith.constant 0 : i32
    %c0_i32_1 = arith.constant 0 : i32
    return %c0_i32, %c0_i32_0 : i32, i32
  }
  func.func @transform_7(%arg0: i32, %arg1: i32, %arg2: i32) -> (i32, i32) {
    %c0_i32 = arith.constant 0 : i32
    %c0_i32_0 = arith.constant 0 : i32
    %c0_i32_1 = arith.constant 0 : i32
    return %c0_i32, %c0_i32_0 : i32, i32
  }
  func.func @transform_8(%arg0: i32, %arg1: i32, %arg2: i32) -> (i32, i32) {
    %c0_i32 = arith.constant 0 : i32
    %c0_i32_0 = arith.constant 0 : i32
    %c0_i32_1 = arith.constant 0 : i32
    return %c0_i32, %c0_i32_0 : i32, i32
  }
  func.func @transform_9(%arg0: i32, %arg1: i32, %arg2: i32) -> (i32, i32) {
    %c0_i32 = arith.constant 0 : i32
    %c0_i32_0 = arith.constant 0 : i32
    %c0_i32_1 = arith.constant 0 : i32
    return %c0_i32, %c0_i32_0 : i32, i32
  }
  func.func @transform_10(%arg0: i32, %arg1: i32, %arg2: i32) -> (i32, i32, i32) {
    %c0_i32 = arith.constant 0 : i32
    %c0_i32_0 = arith.constant 0 : i32
    %c0_i32_1 = arith.constant 0 : i32
    return %arg0, %c0_i32, %c0_i32_0 : i32, i32, i32
  }
}

</mosaic_0001>

<bundles_post_ra>
// kernel: tpu_custom_call.1
= control target key start
LH: loop header
LB: loop body
LE: loop exit
PB: predicated region body
PF: predicated region fallthrough
CT: control target
= control target key end

     0   :  { %s1627_s0 = inlined_call_operand.hbm [shape: f32[2,8,32], index: 0, kind: input, shape index: {}]   ;;  %s1628_s1 = inlined_call_operand.hbm [shape: f32[2,8,32], index: 1, kind: input, shape index: {}]   ;;  %s1629_s2 = inlined_call_operand.hbm [shape: f32[32,32], index: 2, kind: input, shape index: {}]   ;;  %s1630_s3 = inlined_call_operand.hbm [shape: f32[32,32], index: 3, kind: input, shape index: {}]   ;;  %s1631_s4 = inlined_call_operand.hbm [shape: f32[32,32], index: 4, kind: input, shape index: {}]   ;;  %s1632_s5 = inlined_call_operand.hbm [shape: f32[32,32], index: 5, kind: input, shape index: {}]   ;;  %s1633_s6 = inlined_call_operand.vmem [shape: f32[1,32], index: 6, kind: input, shape index: {}]   ;;  %s1634_s7 = inlined_call_operand.vmem [shape: f32[1,32], index: 7, kind: input, shape index: {}]   ;;  %s1635_s8 = inlined_call_operand.vmem [shape: f32[1,32], index: 8, kind: input, shape index: {}]   ;;  %s1636_s9 = inlined_call_operand.vmem [shape: f32[1,32], index: 9, kind: input, shape index: {}]   ;;  %s1637_s10 = inlined_call_operand.hbm [shape: f32[2,1,32], index: 10, kind: output, shape index: {}]  }
   0x1   :  { %1644 = sst [smem:[#allocation31_spill]] %s1629_s2 }
   0x2   :  { %1645 = sst [smem:[#allocation32_spill]] %s1630_s3 }
   0x3   :  { %1646 = sst [smem:[#allocation33_spill]] %s1631_s4 }
   0x4   :  { %1647 = sst [smem:[#allocation34_spill]] %s1632_s5 }
   0x5   :  { %1648 = sst [smem:[#allocation35_spill]] %s1637_s10 }
   0x6   :  { %15 = vsyncpa [#allocation8], 0 }
   0x7   :  { %17 = vsyncpa [#allocation8 + $0x1], 0 }
   0x8   :  { %18 = vsyncpa [#allocation11], 0 }
   0x9   :  { %20 = vsyncpa [#allocation11 + $0x1], 0 }
   0xa   :  { %21 = vsyncpa [#allocation14], 0 }
   0xb   :  { %22 = vsyncpa [#allocation17], 0 }
   0xc   :  { %23 = vsyncpa [#allocation9], 0 }
   0xd   :  { %25 = vsyncpa [#allocation9 + $0x1], 0  ;;  %s1413_s13 = smov 0   ;;  %s1415_s14 = smov 0  }
   0xe   :  { %s1417_s15 = smov 0   ;;  %s1419_s16 = smov 0  }
   0xf   :  { %s1421_s17 = smov 0   ;;  %s1423_s18 = smov 0  }
  0x10 LB: > { %1649 = sst [smem:[#allocation25_spill]] %s1327_s13  ;;  %s1444_s19 = sadd.s32 4294967295, %s1347_s18   ;;  %s1347_s18 = sphi %s1423_s18, %s31_s18   ;;  %s1343_s17 = sphi %s1421_s17, %s1671_s17   ;;  %s1339_s16 = sphi %s1419_s16, %s1670_s16   ;;  %s1335_s15 = sphi %s1417_s15, %s1669_s15   ;;  %s1331_s14 = sphi %s1415_s14, %s1673_s14   ;;  %s1327_s13 = sphi %s1413_s13, %s1672_s13  }
  0x11   : > { %1650 = sst [smem:[#allocation26_spill]] %s1335_s15  ;;  %p917_p0 = scmp.ge.s32.totalorder %s1347_s18, 1 }
  0x12   : > { %1651 = sst [smem:[#allocation27_spill]] %s1343_s17  ;;  %p73_p1 = scmp.eq.s32.totalorder %s1444_s19, 0 }
  0x13   : > { %p305_p2 = scmp.lt.s32.totalorder %s1347_s18, 3  ;;  %s1652_s2 = sld [smem:[#allocation31_spill]] }
  0x14   : > { %s1349_s24 = smov [#allocation12]   ;;  %p922_p6 = scmp.ge.s32.totalorder %s1347_s18, 2 }
  0x15   : > { %p1452_p3 = pnand %p917_p0, %p305_p2  ;;  %s318_s25 = sshll.u32 %s1349_s24, 4  ;;  %s319_s25 = int_to_ptr.vmem [resolvable:$true] %s318_s25 }
  0x16   : > { %s1655_s3 = sld [smem:[#allocation32_spill]]  ;;  %s1350_s30 = smov 128  }
  0x17   : > { %p965_p4 = pneg %p1452_p3  ;;  %s1351_s11 = smov 8  }
  0x18   : > { %s1352_s12 = smov [#allocation13]   ;;  %s1656_s4 = sld [smem:[#allocation33_spill]] }
  0x19   : > { %s316_s22 = sshll.u32 %s1652_s2, 4  ;;  %p1460_p5 = pnand %p965_p4, %p73_p1  ;;  %s317_s22 = int_to_ptr.hbm [resolvable:$true] %s316_s22 }
  0x1a   : > { %s332_s20 = sshll.u32 %s1352_s12, 4  ;;  %s1657_s5 = sld [smem:[#allocation34_spill]]  ;;  %s333_s20 = int_to_ptr.vmem [resolvable:$true] %s332_s20 }
  0x1b   : > { %968 = dma.hbm_to_vmem [thread:$0]  (!%p1460_p5), %s317_s22, 512, %s319_s25, [#allocation11], %s1350_s30, %s1350_s30, %s1351_s11  }
  0x1c   : > { %s330_s29 = sshll.u32 %s1655_s3, 4  ;;  %s1353_s25 = smov [#allocation15]   ;;  %s331_s29 = int_to_ptr.hbm [resolvable:$true] %s330_s29 }
  0x1d   : > { %971 = dma.hbm_to_vmem [thread:$0]  (!%p1460_p5), %s331_s29, 512, %s333_s20, [#allocation14], %s1350_s30, %s1350_s30, %s1351_s11  }
  0x1e   : > { %s344_s2 = sshll.u32 %s1656_s4, 4  ;;  %s346_s3 = sshll.u32 %s1353_s25, 4  ;;  %s345_s2 = int_to_ptr.hbm [resolvable:$true] %s344_s2  ;;  %s347_s3 = int_to_ptr.vmem [resolvable:$true] %s346_s3 }
  0x1f   : > { %974 = dma.hbm_to_vmem [thread:$0]  (!%p1460_p5), %s345_s2, 512, %s347_s3, [#allocation14], %s1350_s30, %s1350_s30, %s1351_s11  }
  0x20   : > { %s358_s22 = sshll.u32 %s1657_s5, 4  ;;  %s1354_s12 = smov [#allocation16]   ;;  %s359_s22 = int_to_ptr.hbm [resolvable:$true] %s358_s22 }
  0x21   : > { %s360_s21 = sshll.u32 %s1354_s12, 4  ;;  %s916_s29 = sadd.s32 4294967294, %s1347_s18   ;;  %s361_s21 = int_to_ptr.vmem [resolvable:$true] %s360_s21 }
  0x22   : > { %977 = dma.hbm_to_vmem [thread:$0]  (!%p1460_p5), %s359_s22, 512, %s361_s21, [#allocation17], %s1350_s30, %s1350_s30, %s1351_s11  }
  0x23   : > { %s50_s20 = sadd.s32 1, %s1343_s17  ;;  %s59_s24 = sadd.s32 1, %s1335_s15 }
  0x24   : > { %p52_p7 = scmp.ge.s32.totalorder %s50_s20, 2  ;;  %p66_p8 = scmp.ne.s32.totalorder %s1335_s15, %s1331_s14 }
  0x25   : > { %p67_p9 = scmp.eq.s32.totalorder %s1347_s18, 0  ;;  %p72_p11 = scmp.ne.s32.totalorder %s1331_s14, %s1327_s13 }
  0x26   : > { %s1675_s20 = smov (%p52_p7, %s50_s20), 0  ;;  %p292_p12 = scmp.eq.s32.totalorder %s1444_s19, 1 }
  0x27   : > { %1658 = sst [smem:[#allocation28_spill]] %s1675_s20  ;;  %p1490_p10 = por %p67_p9, %p66_p8 }
  0x28   : > { %s54_s3 = ssub.s32 %s1343_s17, %s1675_s20  ;;  %p1501_p0 = por %p73_p1, %p72_p11 }
  0x29   : > { %p57_p13 = scmp.eq.s32.totalorder %s54_s3, 0  ;;  %p1505_p2 = por %p292_p12, %p66_p8 }
  0x2a   : > { %p298_p4 = scmp.eq.s32.totalorder %s916_s29, 1  ;;  %p993_p7 = scmp.lt.s32.totalorder %s1347_s18, 2 }
  0x2b   : > { %s1510_s11 = scalar_select %p57_p13, %s1335_s15, %s59_s24  }
  0x2c   : > { %p1512_p5 = por %p298_p4, %p72_p11  ;;  %s386_s28 = sand.u32 1, %s1335_s15  }
  0x2d   : > { %1662 = sst [smem:[#allocation29_spill]] %s1510_s11  ;;  %s924_s22 = sshll.u32 %s1343_s17, 3 }
  0x2e   : > { %s1663_s27 = scalar_select %p1512_p5, 1, 0 }
  0x2f   : > { %s923_s25 = sshll.u32 %s386_s28, 3  ;;  %s395_s3 = scalar_lea.hbm %s1627_s0, %s924_s22 }
  0x30   : > { %1664 = sst [smem:[#allocation30_spill]] %s1663_s27  ;;  %s397_s4 = sshll.u32 %s395_s3, 4  ;;  %s398_s4 = int_to_ptr.hbm [resolvable:$true] %s397_s4 }
  0x31   : > { %s390_s5 = scalar_lea.vmem [#allocation7], %s923_s25  ;;  %p979_p8 = pnand %p993_p7, %p1490_p10 }
  0x32   : > { %s399_s20 = sshll.u32 %s390_s5, 4  ;;  %s415_s11 = scalar_lea.hbm %s1628_s1, %s924_s22  ;;  %s400_s20 = int_to_ptr.vmem [resolvable:$true] %s399_s20 }
  0x33   : > { %s406_s27 = sand.u32 1, %s1347_s18   ;;  %s387_s13 = scalar_lea.sflag [#allocation8], %s386_s28 }
  0x34   : > { %981 = dma.hbm_to_vmem [thread:$0]  (!%p979_p8), %s398_s4, 128, %s400_s20, %s387_s13  }
  0x35   : > { %s417_s17 = sshll.u32 %s415_s11, 4  ;;  %s410_s15 = scalar_lea.vmem [#allocation10], %s923_s25  ;;  %s418_s17 = int_to_ptr.hbm [resolvable:$true] %s417_s17 }
  0x36   : > { %s419_s10 = sshll.u32 %s410_s15, 4  ;;  %s407_s12 = scalar_lea.sflag [#allocation11], %s406_s27  ;;  %s420_s10 = int_to_ptr.vmem [resolvable:$true] %s419_s10 }
  0x37   : > { %984 = dma.hbm_to_vmem [thread:$0]  (!%p979_p8), %s418_s17, 128, %s420_s10, %s407_s12  }
  0x38   : > { %428 = sbr.rel (%p1452_p3) target bundleno = 977 (0x3d1), region = 60  ;;  %s1531_s5 = sand.u32 (!%p1452_p3), 1, %s1331_s14  }
  0x39   : > { %s928_s2 = sshll.u32 (!%p1452_p3), %s1531_s5, 3  ;;  %s431_s22 = scalar_lea.sflag (!%p1452_p3), [#allocation8], %s1531_s5 }
  0x3a   : > { %s434_s28 = scalar_lea.vmem (!%p1452_p3), [#allocation7], %s928_s2 }
  0x3d   : > { %1302 = dma.done.wait (%p1501_p0), %s431_s22, 128  }
  0x3e   : > { %1304 = vsyncadd (%p1501_p0), %s431_s22, 4294967168  ;;  %s440_s4 = sand.u32 1, %s1444_s19   ;;  %s444_s13 = scalar_lea.vmem [#allocation10], %s928_s2 }
  0x3f   : > { %s441_s10 = scalar_lea.sflag [#allocation11], %s440_s4 }
  0x40   : > { %1306 = dma.done.wait (%p1501_p0), %s441_s10, 128  }
  0x41   : > { %1308 = vsyncadd (%p1501_p0), %s441_s10, 4294967168 }
  0x42   : > { %1310 = dma.done.wait (%p73_p1), [#allocation11], 512  }
  0x43   : > { %1312 = vsyncadd (%p73_p1), [#allocation11], 4294966784 }
  0x44   : > { %1314 = dma.done.wait (%p73_p1), [#allocation14], 1024  }
  0x45   : > { %1316 = vsyncadd (%p73_p1), [#allocation14], 4294966272 }
  0x46   : > { %1318 = dma.done.wait (%p73_p1), [#allocation17], 512  }
  0x47   : > { %1320 = vsyncadd (%p73_p1), [#allocation17], 4294966784  ;;  %v514_v0 = vld [vmem:[#allocation12 + $0x18] sm:$0xff]  ;;  %v513_v1 = vld [vmem:[#allocation12 + $0x10] sm:$0xff]  ;;  %vm519_vm0 = vcmask 261120   ;;  %vm545_vm1 = vcmask 7168  }
  0x48   : > { %535 = vmatpush.msra.mxu0 %v514_v0  ;;  %v560_v2 = vld [vmem:[#allocation13 + $0x18] sm:$0xff]  ;;  %v512_v3 = vld [vmem:[#allocation12 + $0x8] sm:$0xff]  ;;  %v559_v4 = vld [vmem:[#allocation13 + $0x10] sm:$0xff]  ;;  %v1355_v20 = vmov -inf   ;;  %vm645_vm2 = vcmask 64512   ;;  %v1356_v25 = vmov 0  }
  0x49   : > { %581 = vmatpush.msra.mxu1 %v560_v2  ;;  %v511_v5 = vld [vmem:[#allocation12] sm:$0xff]  ;;  %v558_v6 = vld [vmem:[#allocation13 + $0x8] sm:$0xff]  ;;  %v556_v9 = vld [vmem:[%s444_s13] sm:$0xff]  ;;  %546 = vst.msk [vmem:[#allocation3] sm:$0xff] %vm545_vm1, %v1355_v20  ;;  %1056 = vset.pattern.permute.xlu0 %v1356_v25  ;;  %v1357_v26 = vmov 0.0   ;;  %vm554_vm3 = vcmask 253952  }
  0x4a   : > { %536 = vmatpush.msra.mxu0 %v513_v1  ;;  %v510_v7 = vld [vmem:[%s434_s28] sm:$0xff]  ;;  %v1059_v10 = vld [vmem:[%s1633_s6] ss:$0 sm:$0xff]  ;;  %v591_v19 = vld [vmem:[#allocation15 + $0x10] sm:$0xff]  ;;  %1057 = vset.pattern.permute.xlu1 %v1356_v25  ;;  %547 = vst.msk [vmem:[#allocation4] sm:$0xff] %vm545_vm1, %v1357_v26  ;;  %s1665_s3 = sld [smem:[#allocation35_spill]] }
  0x4b   : > { %582 = vmatpush.msra.mxu1 %v559_v4  ;;  %v557_v8 = vld [vmem:[#allocation13] sm:$0xff]  ;;  %v1060_v11 = vld [vmem:[%s1634_s7] ss:$0 sm:$0xff]  ;;  %v590_v21 = vld [vmem:[#allocation15 + $0x8] sm:$0xff]  ;;  %1058 = vset.pattern.permute.xlu2 %v1356_v25  ;;  %548 = vst.msk [vmem:[#allocation5] sm:$0xff] %vm519_vm0, %v1357_v26  ;;  %s505_s24 = scalar_lea.vmem [#allocation18], %s1531_s5 }
  0x4c   : > { %537 = vmatpush.msra.mxu0 %v512_v3  ;;  %v592_v18 = vld [vmem:[#allocation15 + $0x18] sm:$0xff]  ;;  %v589_v22 = vld [vmem:[#allocation15] sm:$0xff]  ;;  %v716_v43 = vld [vmem:[#allocation16 + $0x10] sm:$0xff]  ;;  %555 = vst.msk [vmem:[#allocation6] sm:$0x1] %vm554_vm3, %v1357_v26  ;;  %s773_s12 = sshll.u32 %s505_s24, 4  ;;  %s774_s12 = int_to_ptr.vmem [resolvable:$true] %s773_s12 }
  0x4d   : > { %583 = vmatpush.msra.mxu1 %v558_v6  ;;  %609 = vmatpush.msra.mxu2 %v592_v18  ;;  %v1061_v31 = vld [vmem:[%s1635_s8] ss:$0 sm:$0xff]  ;;  %v715_v45 = vld [vmem:[#allocation16 + $0x8] sm:$0xff]  ;;  %v714_v55 = vld [vmem:[#allocation16] sm:$0xff]  ;;  %s763_s22 = scalar_lea.sflag [#allocation9], %s1531_s5 }
  0x4e   : > { %538 = vmatpush.msra.mxu0 %v511_v5  ;;  %v717_v42 = vld [vmem:[#allocation16 + $0x18] sm:$0xff] }
  0x4f   : > { %934 = vmatmul.msk.f32.vlgmr.msra.gmra.mxu0 %vm519_vm0, %v510_v7  ;;  %584 = vmatpush.msra.mxu1 %v557_v8  ;;  %v1062_v59 = vld [vmem:[%s1636_s9] ss:$0 sm:$0xff] }
  0x50   : > { %935 = vmatmul.msk.f32.vlgmr.msra.gmra.mxu1 %vm519_vm0, %v556_v9  ;;  %610 = vmatpush.msra.mxu2 %v591_v19  ;;  %v644_v27 = vld [vmem:[#allocation3] sm:$0xff]  ;;  %s771_s29 = scalar_lea.hbm %s1665_s3, %s1339_s16  ;;  %s1269_s16 = scalar_lea.hbm %s1665_s3, 2 }
  0x51   : > { %v661_v41 = vld [vmem:[#allocation4] sm:$0xff]  ;;  %737 = vmatpush.msrb.mxu0 %v717_v42  ;;  %s775_s2 = sshll.u32 %s771_s29, 4  ;;  %s776_s2 = int_to_ptr.hbm [resolvable:$true] %s775_s2 }
  0x52   : > { %611 = vmatpush.msra.mxu2 %v590_v21  ;;  %v669_v50 = vld [vmem:[#allocation5] sm:$0xff]  ;;  %s1263_s28 = sshra.s32 %s776_s2, 4  ;;  %s1264_s28 = int_to_ptr.hbm [resolvable:$true] %s1263_s28 }
  0x53   : > { %738 = vmatpush.msrb.mxu0 %v716_v43  ;;  %v745_v4 = vld [vmem:[#allocation6] sm:$0x1]  ;;  %s1265_s4 = scalar_lea.hbm %s1264_s28, 1  ;;  %p1270_p10 = scmp.lt.s32.totalorder %s1264_s28, %s1665_s3 }
  0x54   : > { %612 = vmatpush.msra.mxu2 %v589_v22  ;;  %p1266_p1 = scmp.ne.s32.totalorder %s1264_s28, %s1265_s4  ;;  %p1271_p11 = scmp.lt.s32.totalorder %s1269_s16, %s1265_s4 }
  0x55   : > { %936 = vmatmul.msk.f32.vlgmr.msra.gmra.mxu2 %vm519_vm0, %v556_v9  ;;  %739 = vmatpush.msrb.mxu0 %v715_v45 }
  0x56   : > { %p1267_p3 = pnand %p1266_p1, %p1505_p2  ;;  %p1272_p12 = por %p1271_p11, %p1270_p10 }
  0x57   : > { %740 = vmatpush.msrb.mxu0 %v714_v55 }
  0x58   : > { %p1268_p9 = pneg %p1267_p3 }
  0x5a   : > { %p1273_p13 = pnand %p1272_p12, %p1268_p9 }
  0xcc   : > { %v540_v12 = vpop.f32.mrf.mxu0 }
  0xcd   : > { %v541_v13 = vadd.f32 %v1059_v10, %v540_v12  ;;  %v586_v14 = vpop.f32.mrf.mxu1 }
  0xce   : > { %v587_v15 = vadd.f32 %v1060_v11, %v586_v14 }
  0xcf   : > { %v543_v16 = vmul.f32 0.17677669, %v541_v13 }
  0xd0   : > { %937 = vmatpush.xpose.msk.msra.mxu3 %vm519_vm0, %v587_v15 }
  0xd1   : > { %544 = vst.msk [vmem:[#allocation2] sm:$0xff] %vm519_vm0, %v543_v16 }
  0xd8   : > { %v617_v17 = vld [vmem:[#allocation2] sm:$0xff]  ;;  %v614_v32 = vpop.f32.mrf.mxu2 }
  0xd9   : > { %938 = vmatmul.msk.f32.vlgmr.msra.gmra.mxu3 %vm519_vm0, %v617_v17  ;;  %v615_v33 = vadd.f32 %v1061_v31, %v614_v32 }
  0xdb   : > { %694 = vmatpush.msrb.mxu3 %v615_v33 }
 0x15c   : > { %v641_v23 = vpop.f32.mrf.mxu3 }
 0x15d   : > { %v646_v24 = vsel %vm645_vm2, %v641_v23, -inf }
 0x15e   : > { %647 = vmax.xlane.f32.xlu0 %v646_v24 }
 0x1d1   : > { %v648_v28 = vpop.xlane.xlu0 %647 }
 0x1d2   : > { %v649_v29 = vmax.f32 %v644_v27, %v648_v28 }
 0x1d4   : > { %v650_v30 = vsub.f32 %v644_v27, %v649_v29  ;;  %701 = vst.msk [vmem:[#allocation3] sm:$0xff] %vm545_vm1, %v649_v29  ;;  %655 = vperm.xlu0 %1056, %v649_v29  }
 0x1d6   : > { %v651_v39 = vmul.f32 1.442695, %v650_v30 }
 0x246   : > { %v656_v34 = vpop.permute.xlu0 %655 }
 0x247   : > { %v658_v35 = vsub.f32 %v641_v23, %v656_v34 }
 0x249   : > { %v659_v36 = vmul.f32 1.442695, %v658_v35 }
 0x24b   : > { %1063 = vpow2.f32 %v659_v36 }
 0x24c   : > { %1065 = vpow2.f32 %v651_v39 }
 0x251   : > { %v1064_v37 = vpop.eup %1063 }
 0x252   : > { %939 = vmatmul.msk.f32.vlgmr.msrb.gmra.mxu3 %vm645_vm2, %v1064_v37  ;;  %v663_v38 = vsel %vm645_vm2, %v1064_v37, 0.0  ;;  %v1066_v40 = vpop.eup %1065 }
 0x253   : > { %664 = vadd.xlane.f32.xlu1 %v663_v38  ;;  %v662_v44 = vmul.f32 %v1066_v40, %v661_v41 }
 0x26c   : > { %672 = vperm.xlu1 %1057, %v1066_v40  }
 0x2c6   : > { %v665_v46 = vpop.xlane.xlu1 %664 }
 0x2c7   : > { %v666_v47 = vadd.f32 %v665_v46, %v662_v44 }
 0x2c9   : > { %668 = vst.msk [vmem:[#allocation4] sm:$0xff] %vm545_vm1, %v666_v47 }
 0x2d0   : > { %v706_v48 = vld [vmem:[#allocation4] sm:$0xff] }
 0x2d1   : > { %1067 = vrcp.f32 %v706_v48 }
 0x2d5   : > { %v696_v53 = vpop.f32.mrf.mxu3 }
 0x2d7   : > { %v1068_v49 = vpop.eup %1067 }
 0x2d8   : > { %710 = vperm.xlu2 %1058, %v1068_v49  }
 0x2de   : > { %v673_v51 = vpop.permute.xlu1 %672 }
 0x2df   : > { %v675_v52 = vmul.f32 %v673_v51, %v669_v50 }
 0x2e1   : > { %v699_v54 = vadd.f32 %v696_v53, %v675_v52 }
 0x2e3   : > { %700 = vst.msk [vmem:[#allocation5] sm:$0xff] %vm519_vm0, %v699_v54 }
 0x2ea   : > { %v705_v56 = vld [vmem:[#allocation5] sm:$0xff] }
 0x332   : > { %v711_v57 = vpop.permute.xlu2 %710 }
 0x333   : > { %v713_v58 = vmul.f32 %v711_v57, %v705_v56 }
 0x335   : > { %940 = vmatmul.msk.f32.vlgmr.msrb.gmra.mxu0 %vm519_vm0, %v713_v58 }
 0x3b2   : > { %v742_v60 = vpop.f32.mrf.mxu0 }
 0x3b3   : > { %v743_v61 = vadd.f32 %v1062_v59, %v742_v60 }
 0x3b5   : > { %v746_v62 = vsel %vm519_vm0, %v743_v61, 0.0 }
 0x3b6   : > { %v747_v63 = vrot.slane %v746_v62, 4 }
 0x3b8   : > { %v748_v0 = vadd.f32 %v747_v63, %v746_v62 }
 0x3ba   : > { %v749_v1 = vrot.slane %v748_v0, 2 }
 0x3bc   : > { %v750_v2 = vadd.f32 %v749_v1, %v748_v0 }
 0x3be   : > { %v751_v3 = vrot.slane %v750_v2, 1 }
 0x3c0   : > { %v752_v5 = vadd.f32 %v751_v3, %v750_v2 }
 0x3c2   : > { %v753_v6 = vadd.f32 %v752_v5, %v745_v4 }
 0x3c4   : > { %755 = vst.msk [vmem:[#allocation6] sm:$0x1] %vm554_vm3, %v753_v6 }
 0x3cb   : > { %v758_v7 = vld [vmem:[#allocation6] sm:$0x1] }
 0x3cc   : > { %v759_v8 = vmul.f32 0.125, %v758_v7 }
 0x3ce   : > { %761 = vst.msk [vmem:[%s505_s24] sm:$0x1] %vm554_vm3, %v759_v8 }
 0x3cf   : > { %1276 = shalt.err (!%p1273_p13)
}
 0x3d0   : > { %963 = dma.vmem_to_hbm [thread:$0]  (%p1505_p2), %s774_s12, 16, %s776_s2, %s763_s22  }
 0x3d1 PF: > { %s1666_s5 = sld [smem:[#allocation25_spill]]  ;;  %p986_p0 = pnand %p922_p6, %p1512_p5 }
 0x3d3   : > { %p987_p4 = pneg %p986_p0 }
 0x3d7   : > { %s787_s23 = sand.u32 1, %s1666_s5  }
 0x3d8   : > { %s788_s20 = scalar_lea.sflag [#allocation9], %s787_s23 }
 0x3d9   : > { %1322 = dma.done.wait (%p987_p4), %s788_s20, 16  }
 0x3da   : > { %1324 = vsyncadd (%p987_p4), %s788_s20, 4294967280  ;;  %s31_s18 = sadd.s32 1, %s1347_s18   ;;  %s1668_s26 = sld [smem:[#allocation26_spill]] }
 0x3db   : > { %p28_p7 = scmp.ge.s32.totalorder %s31_s18, 4   ;;  %s1669_s15 = sld [smem:[#allocation29_spill]] }
 0x3dc   : > { %s1670_s16 = sld [smem:[#allocation27_spill]]  ;;  %s1672_s13 = smov %s1331_s14 }
 0x3dd   : > { %s1671_s17 = sld [smem:[#allocation28_spill]]  ;;  %30 = sbr.rel (!%p28_p7) target bundleno = 16 (0x10), region = 150 }
 0x3e0   : > { %s1673_s14 = smov %s1668_s26 }
 0x3e2   :  { %793 = vsyncpa [#allocation8], 1 }
 0x3e3   :  { %795 = vsyncpa [#allocation8 + $0x1], 1 }
 0x3e4   :  { %796 = vsyncpa [#allocation11], 1 }
 0x3e5   :  { %798 = vsyncpa [#allocation11 + $0x1], 1 }
 0x3e6   :  { %799 = vsyncpa [#allocation14], 1 }
 0x3e7   :  { %800 = vsyncpa [#allocation17], 1 }
 0x3e8   :  { %801 = vsyncpa [#allocation9], 1 }
 0x3e9   :  { %803 = vsyncpa [#allocation9 + $0x1], 1 }

</bundles_post_ra>
